<compile_context>
chip_gen: v6e
topology: v6e:2x2x1
jax: 0.10.0
libtpu: 0.0.40
codegen_flags: <defaults>
</compile_context>

<pallas_src>
import numpy as np
import jax
import jax.numpy as jnp
from jax.experimental import pallas as pl
from jax.experimental.pallas import tpu as pltpu

_MiB = 1024 * 1024


def get_kernel(factor, kernel_type, phase, kernel_width, support=None, sigma=None):
    # Same as the reference: normalized box kernel regardless of kernel_type.
    kernel = np.ones((kernel_width, kernel_width), dtype=np.float32)
    return kernel / np.sum(kernel)


def _separate_kernel(kernel):
    """Return (row_w, col_w) if `kernel` is numerically rank-1, else None."""
    k = np.asarray(kernel, np.float64)
    u, s, vt = np.linalg.svd(k)
    if s[0] <= 0.0 or (s.size > 1 and s[1] > 1e-6 * s[0]):
        return None
    r = (u[:, 0] * np.sqrt(s[0])).astype(np.float32)
    c = (vt[0, :] * np.sqrt(s[0])).astype(np.float32)
    return r, c


def _tpu_params():
    """Generation-aware VMEM budgets (conservative fallback if unknown)."""
    try:
        kind = jax.devices()[0].device_kind.lower()
    except Exception:
        kind = ""
    if "v7" in kind:           # 64 MiB physical VMEM, 2 TensorCores
        return dict(input_budget=5 * _MiB, vmem_cap=48 * _MiB, num_cores=2)
    if "v6" in kind:           # 128 MiB physical, 1 TC
        return dict(input_budget=10 * _MiB, vmem_cap=96 * _MiB, num_cores=1)
    if "v5p" in kind or "v4" in kind:   # 128 MiB physical, megacore
        return dict(input_budget=8 * _MiB, vmem_cap=96 * _MiB, num_cores=2)
    if "v5" in kind:           # v5e: 128 MiB physical, 1 TC, 16 MiB default scoped
        return dict(input_budget=8 * _MiB, vmem_cap=96 * _MiB, num_cores=1)
    return dict(input_budget=4 * _MiB, vmem_cap=48 * _MiB, num_cores=1)


def _divisors_desc(n):
    return [d for d in range(n, 0, -1) if n % d == 0]


def _step_vmem_bytes(b, H, W, HOUT, WOUT, kcols, in_item, out_item, mxu_item, const_bytes):
    total = 2 * b * H * W * in_item            # double-buffered input block
    total += 2 * b * HOUT * WOUT * out_item    # double-buffered output block
    total += 2 * const_bytes                   # (small) weight-matrix block
    total += b * HOUT * kcols * 4              # f32 row-pass result
    if mxu_item != 4:
        total += b * HOUT * kcols * mxu_item   # bf16 MXU operand copy
    total += b * HOUT * WOUT * 4               # f32 matmul result
    return total


def _downsample_pallas(x, kernel, stride):
    N, C, H, W = x.shape
    KW = int(kernel.shape[0])
    stride = int(stride)
    HOUT = (H - KW) // stride + 1
    WOUT = (W - KW) // stride + 1
    NC = N * C
    assert HOUT > 0 and WOUT > 0, "input smaller than the downsampling kernel"

    params = _tpu_params()
    in_item = jnp.dtype(x.dtype).itemsize
    out_item = in_item

    # MXU operand dtype: f32 for narrow planes (kernel is HBM-bound there anyway),
    # bf16 for wide planes / bf16 inputs (halves operand bytes).
    use_bf16 = (x.dtype == jnp.bfloat16) or (W >= 256)
    mxu_dtype = jnp.bfloat16 if use_bf16 else jnp.float32
    mxu_item = 2 if use_bf16 else 4

    sep = _separate_kernel(kernel)

    if sep is not None:
        row_w, col_w = sep
        uniform_rows = bool(np.allclose(row_w, row_w[0], rtol=1e-6, atol=1e-12))
        # Fold the global scale into Cw when the row weights are uniform (box kernel).
        col_scale = col_w * float(row_w[0]) if uniform_rows else col_w
        Cw = np.zeros((W, WOUT), np.float32)
        for kw in range(KW):
            for j in range(WOUT):
                Cw[j * stride + kw, j] += col_scale[kw]
        const_np = Cw
        kcols = W
    else:
        uniform_rows = False
        row_w = None
        Wm = np.zeros((KW, W, WOUT), np.float32)
        for kh in range(KW):
            for kw in range(KW):
                for j in range(WOUT):
                    Wm[kh, j * stride + kw, j] += kernel[kh, kw]
        const_np = Wm.reshape(KW * W, WOUT)
        kcols = KW * W

    const_arg = jnp.asarray(const_np, dtype=mxu_dtype)
    const_bytes = int(const_arg.size) * mxu_item

    # ---- planes per grid step: largest divisor of NC that fits the budget ----
    plane_in_bytes = H * W * in_item
    b = 1
    for d in _divisors_desc(NC):
        if (d * plane_in_bytes <= params["input_budget"]
                and _step_vmem_bytes(d, H, W, HOUT, WOUT, kcols, in_item,
                                     out_item, mxu_item, const_bytes) <= params["vmem_cap"]):
            b = d
            break
    # Multi-TensorCore parts only: prefer >= num_cores parallel grid steps.
    if params["num_cores"] > 1 and NC >= params["num_cores"] and NC // b < params["num_cores"]:
        for d in _divisors_desc(NC):
            if d <= b and NC // d >= params["num_cores"]:
                b = d
                break
    G = NC // b

    needed = _step_vmem_bytes(b, H, W, HOUT, WOUT, kcols, in_item, out_item,
                              mxu_item, const_bytes)
    vmem_limit = int(min(params["vmem_cap"],
                         max(16 * _MiB, needed + needed // 4 + 2 * _MiB)))

    xf = x.reshape(NC, H, W)   # free reshape, no HBM copy (no zero-pad concat)

    def _rsl(kh):
        return pl.ds(kh, HOUT, stride=stride) if stride > 1 else pl.ds(kh, HOUT)

    if sep is not None:
        rw = [float(w_) for w_ in row_w]

        def kernel_body(x_ref, cw_ref, o_ref):
            # Row pass: (weighted) sum of strided sublane slices, accumulated in f32.
            if uniform_rows:
                y = x_ref[:, _rsl(0), :].astype(jnp.float32)
                for kh in range(1, KW):                       # static unroll
                    y = y + x_ref[:, _rsl(kh), :].astype(jnp.float32)
            else:
                y = rw[0] * x_ref[:, _rsl(0), :].astype(jnp.float32)
                for kh in range(1, KW):
                    y = y + rw[kh] * x_ref[:, _rsl(kh), :].astype(jnp.float32)
            # Column pass: one batched MXU matmul, kept 3-D so b and HOUT are never
            # merged (no (8,128) relayout when HOUT % 8 != 0). Conv bias is zero.
            z = jnp.einsum('bhw,wo->bho', y.astype(mxu_dtype), cw_ref[...],
                           preferred_element_type=jnp.float32)
            o_ref[...] = z.astype(o_ref.dtype)

        const_spec = pl.BlockSpec((W, WOUT), lambda i: (0, 0))
    else:
        def kernel_body(x_ref, wm_ref, o_ref):
            # Stack the KW row slabs along lanes and do ONE matmul (no f32
            # accumulator held live across KW separate matmuls).
            slabs = [x_ref[:, _rsl(kh), :].astype(jnp.float32) for kh in range(KW)]
            yk = jnp.concatenate(slabs, axis=-1).astype(mxu_dtype)   # (b, HOUT, KW*W)
            z = jnp.einsum('bhw,wo->bho', yk, wm_ref[...],
                           preferred_element_type=jnp.float32)
            o_ref[...] = z.astype(o_ref.dtype)

        const_spec = pl.BlockSpec((KW * W, WOUT), lambda i: (0, 0))

    out = pl.pallas_call(
        kernel_body,
        out_shape=jax.ShapeDtypeStruct((NC, HOUT, WOUT), x.dtype),
        grid=(G,),
        in_specs=[
            pl.BlockSpec((b, H, W), lambda i: (i, 0, 0)),
            const_spec,
        ],
        out_specs=pl.BlockSpec((b, HOUT, WOUT), lambda i: (i, 0, 0)),
        compiler_params=pltpu.CompilerParams(
            dimension_semantics=("parallel",),
            vmem_limit_bytes=vmem_limit,
        ),
    )(xf, const_arg)

    return out.reshape(N, C, HOUT, WOUT)


class Downsampler:
    """JAX/Pallas port of the PyTorch Downsampler module (forward pass)."""

    def __init__(self, n_planes, factor, kernel_type, phase=0, kernel_width=None,
                 support=None, sigma=None, preserve_size=False):
        assert phase in [0, 0.5], 'phase should be 0 or 0.5'
        if kernel_type == 'lanczos2':
            support, kernel_width, kernel_type_ = 2, 4 * factor + 1, 'lanczos'
        elif kernel_type == 'lanczos3':
            support, kernel_width, kernel_type_ = 3, 6 * factor + 1, 'lanczos'
        elif kernel_type == 'gauss12':
            kernel_width, sigma, kernel_type_ = 7, 0.5, 'gauss'
        elif kernel_type == 'gauss1sq2':
            kernel_width, sigma, kernel_type_ = 9, 1.0 / np.sqrt(2), 'gauss'
        elif kernel_type in ['lanczos', 'gauss', 'box']:
            kernel_type_ = kernel_type
        else:
            assert False, 'wrong kernel name'

        self.kernel = get_kernel(factor, kernel_type_, phase, kernel_width,
                                 support=support, sigma=sigma)
        self.factor = factor
        self.n_planes = n_planes
        self.preserve_size = preserve_size
        if preserve_size:
            if self.kernel.shape[0] % 2 == 1:
                self.pad = int((self.kernel.shape[0] - 1) / 2.0)
            else:
                self.pad = int((self.kernel.shape[0] - factor) / 2.0)

    def __call__(self, x):
        if self.preserve_size:
            # ReplicationPad2d == edge padding of the spatial dims (glue, not hot path).
            x = jnp.pad(x, ((0, 0), (0, 0), (self.pad, self.pad), (self.pad, self.pad)),
                        mode='edge')
        return _downsample_pallas(x, self.kernel, self.factor)


if __name__ == "__main__":
    key = jax.random.PRNGKey(0)
    N, C, H, W = 2, 4, 16, 16
    x = jax.random.normal(key, (N, C, H, W), dtype=jnp.float32)

    ds = Downsampler(n_planes=C, factor=2, kernel_type='box', kernel_width=4, phase=0)
    y = jax.block_until_ready(ds(x))

    # Reference: depthwise strided conv with the same kernel (what the PyTorch conv does).
    w = jnp.tile(jnp.asarray(ds.kernel)[None, None], (C, 1, 1, 1))  # (C, 1, KW, KW)
    ref = jax.lax.conv_general_dilated(
        x, w, window_strides=(2, 2), padding='VALID',
        dimension_numbers=('NCHW', 'OIHW', 'NCHW'), feature_group_count=C)

    assert y.shape == ref.shape == (N, C, 7, 7), (y.shape, ref.shape)
    assert np.allclose(np.asarray(y), np.asarray(ref), atol=1e-2, rtol=1e-2)
    print("KERNEL_OK")
</pallas_src>

<mosaic_0001>
module attributes {stable_mosaic.version = 11 : i64} {
  func.func @kernel_body(%arg0: i32, %arg1: memref<8x16x16xf32, #tpu.memory_space<vmem>>, %arg2: memref<16x7xf32, #tpu.memory_space<vmem>>, %arg3: memref<8x7x7xf32, #tpu.memory_space<vmem>>) attributes {dimension_semantics = [#tpu.dimension_semantics<parallel>], iteration_bounds = array<i64: 1>, scalar_prefetch = 0 : i64, scratch_operands = 0 : i64, tpu.core_type = #tpu.core_type<tc>, window_params = [{transform_indices = @transform_0, window_bounds = array<i64: 8, 16, 16>}, {pipeline_mode = #tpu.pipeline_mode<synchronous>, transform_indices = @transform_1, window_bounds = array<i64: 16, 7>}, {transform_indices = @transform_2, window_bounds = array<i64: 8, 7, 7>}]} {
    %c0 = arith.constant 0 : index
    %c0_0 = arith.constant 0 : index
    %c0_1 = arith.constant 0 : index
    %0 = tpu.strided_load %arg1[%c0, %c0_0, %c0_1] {strides = array<i32: 1, 2, 1>} : memref<8x16x16xf32, #tpu.memory_space<vmem>>, vector<8x7x16xf32>
    %c0_2 = arith.constant 0 : index
    %c1 = arith.constant 1 : index
    %c0_3 = arith.constant 0 : index
    %1 = tpu.strided_load %arg1[%c0_2, %c1, %c0_3] {strides = array<i32: 1, 2, 1>} : memref<8x16x16xf32, #tpu.memory_space<vmem>>, vector<8x7x16xf32>
    %2 = arith.addf %0, %1 : vector<8x7x16xf32>
    %c0_4 = arith.constant 0 : index
    %c2 = arith.constant 2 : index
    %c0_5 = arith.constant 0 : index
    %3 = tpu.strided_load %arg1[%c0_4, %c2, %c0_5] {strides = array<i32: 1, 2, 1>} : memref<8x16x16xf32, #tpu.memory_space<vmem>>, vector<8x7x16xf32>
    %4 = arith.addf %2, %3 : vector<8x7x16xf32>
    %c0_6 = arith.constant 0 : index
    %c3 = arith.constant 3 : index
    %c0_7 = arith.constant 0 : index
    %5 = tpu.strided_load %arg1[%c0_6, %c3, %c0_7] {strides = array<i32: 1, 2, 1>} : memref<8x16x16xf32, #tpu.memory_space<vmem>>, vector<8x7x16xf32>
    %6 = arith.addf %4, %5 : vector<8x7x16xf32>
    %c0_8 = arith.constant 0 : index
    %c0_9 = arith.constant 0 : index
    %7 = vector.load %arg2[%c0_8, %c0_9] : memref<16x7xf32, #tpu.memory_space<vmem>>, vector<16x7xf32>
    "tpu.trace_start"() <{level = 10 : i32, message = "bhw,wo->bho"}> : () -> ()
    %cst = arith.constant dense<0.000000e+00> : vector<8x7x7xf32>
    %8 = tpu.matmul %6, %7, %cst {dimension_numbers = #tpu.dot_dimension_numbers<[2], [0], [0, 1], [1], [0, 0, 0, 1, 1, 1], [], []>} : vector<8x7x16xf32>, vector<16x7xf32>, vector<8x7x7xf32> -> vector<8x7x7xf32>
    "tpu.trace_stop"() : () -> ()
    %c0_10 = arith.constant 0 : index
    %c0_11 = arith.constant 0 : index
    %c0_12 = arith.constant 0 : index
    %9 = vector.load %arg3[%c0_10, %c0_11, %c0_12] : memref<8x7x7xf32, #tpu.memory_space<vmem>>, vector<8x7x7xf32>
    tpu.vector_store %arg3[%c0_10, %c0_11, %c0_12], %8 {strides = array<i32>} : memref<8x7x7xf32, #tpu.memory_space<vmem>>, vector<8x7x7xf32>,
    return
  }
  func.func @transform_0(%arg0: i32) -> (i32, i32, i32) {
    %c0_i32 = arith.constant 0 : i32
    %c0_i32_0 = arith.constant 0 : i32
    %c0_i32_1 = arith.constant 0 : i32
    return %arg0, %c0_i32, %c0_i32_0 : i32, i32, i32
  }
  func.func @transform_1(%arg0: i32) -> (i32, i32) {
    %c0_i32 = arith.constant 0 : i32
    %c0_i32_0 = arith.constant 0 : i32
    %c0_i32_1 = arith.constant 0 : i32
    return %c0_i32, %c0_i32_0 : i32, i32
  }
  func.func @transform_2(%arg0: i32) -> (i32, i32, i32) {
    %c0_i32 = arith.constant 0 : i32
    %c0_i32_0 = arith.constant 0 : i32
    %c0_i32_1 = arith.constant 0 : i32
    return %arg0, %c0_i32, %c0_i32_0 : i32, i32, i32
  }
}

</mosaic_0001>

<bundles_post_ra>
// kernel: tpu_custom_call.1
= control target key start
LH: loop header
LB: loop body
LE: loop exit
PB: predicated region body
PF: predicated region fallthrough
CT: control target
= control target key end

     0   :  { %7 = vsyncpa [#allocation3], 0  ;;  %s1803_s9 = smov [#allocation2]   ;;  %s2124_s0 = inlined_call_operand.hbm [shape: f32[8,16,16], index: 0, kind: input, shape index: {}]   ;;  %s2125_s1 = inlined_call_operand.vmem [shape: f32[16,7], index: 1, kind: input, shape index: {}]   ;;  %s2126_s2 = inlined_call_operand.vmem [shape: f32[8,7,7], index: 2, kind: output, shape index: {}]  }
   0x1   :  { %s13_s10 = sshll.u32 %s1803_s9, 4  ;;  %s14_s10 = int_to_ptr.vmem [resolvable:$true] %s13_s10 }
   0x2   :  { %s1789_s11 = scalar_lea.vmem %s14_s10, 2048  ;;  %p1794_p1 = scmp.lt.s32.totalorder %s14_s10, %s14_s10 }
   0x3   :  { %p1790_p0 = scmp.ne.s32.totalorder %s14_s10, %s1789_s11  ;;  %p1795_p2 = scmp.lt.s32.totalorder %s1789_s11, %s1789_s11 }
   0x5   :  { %p1796_p3 = por %p1795_p2, %p1794_p1 }
   0x7   :  { %p1797_p4 = pnand %p1796_p3, %p1790_p0 }
   0x9   :  { %1800 = shalt.err (!%p1797_p4)
}
   0xa   :  { %s1804_s12 = smov 128   ;;  %s1805_s13 = smov 8  }
   0xb   :  { %19 = dma.hbm_to_vmem [thread:$0]  %s2124_s0, 2048, %s14_s10, [#allocation3], %s1804_s12, %s1804_s12, %s1805_s13  }
   0xc   :  { %1801 = dma.done.wait [#allocation3], 2048  }
   0xd   :  { %1802 = vsyncadd [#allocation3], 4294965248  ;;  %v1806_v0 = vmov 0.0   ;;  %vm1807_vm0 = vmmov 0   ;;  %v126_v1 = vlaneseq  ;;  %v1808_v2 = vmov 1966171168  }
   0xe   :  { %1746 = vmatprep.subr.mxu0 %v1806_v0  ;;  %1771 = vmatprep.subr.mxu1 %v1806_v0  ;;  %v124_v3 = vunpack.c.l.s4 %v1808_v2  ;;  %v113_v4 = vld [vmem:[%s2125_s1 + $0x8] sm:$0xff]  ;;  %v112_v5 = vld [vmem:[%s2125_s1] sm:$0xff]  ;;  %v27_v8 = vld [vmem:[#allocation2 + $0x10] ss:$2 sm:$0x7f]  ;;  %vm849_vm1 = vcmask 130048  }
   0xf   :  { %1750 = vmatprep.mubr.msk.f32.mxu0 %vm1807_vm0, %v1806_v0  ;;  %1762 = vmatprep.mubr.msk.f32.mxu1 %vm1807_vm0, %v1806_v0  ;;  %v25_v6 = vld [vmem:[#allocation2] ss:$2 sm:$0x7f]  ;;  %v127_v7 = vshrl.u32 %v126_v1, 7  ;;  %vm1706_vm2 = vcmask 55296  }
  0x10   :  { %1747 = vmatpush3.msra.mxu0 %v113_v4  ;;  %1773 = vmatpush3.msra.mxu1 %v113_v4  ;;  %v41_v9 = vld [vmem:[#allocation2 + $0x1] ss:$2 sm:$0x7f]  ;;  %v43_v10 = vld [vmem:[#allocation2 + $0x11] ss:$2 sm:$0x7f]  ;;  %v125_v13 = vunpack.c.0.s8 %v124_v3 }
  0x11   :  { %1748 = vmatprep.subr.mxu0 %v1806_v0  ;;  %1772 = vmatprep.subr.mxu1 %v1806_v0  ;;  %v56_v11 = vadd.f32 %v41_v9, %v25_v6  ;;  %v65_v12 = vld [vmem:[#allocation2 + $0x2] ss:$2 sm:$0x7f]  ;;  %v57_v14 = vadd.f32 %v43_v10, %v27_v8  ;;  %v67_v15 = vld [vmem:[#allocation2 + $0x12] ss:$2 sm:$0x7f] }
  0x12   :  { %1749 = vmatpush3.msra.mxu0 %v112_v5  ;;  %1774 = vmatpush3.msra.mxu1 %v112_v5  ;;  %v89_v16 = vld [vmem:[#allocation2 + $0x3] ss:$2 sm:$0x7f]  ;;  %v91_v18 = vld [vmem:[#allocation2 + $0x13] ss:$2 sm:$0x7f]  ;;  %v1841_v24 = vsub.s32 %v125_v13, %v127_v7 }
  0x13   :  { %v80_v17 = vadd.f32 %v65_v12, %v56_v11  ;;  %v33_v19 = vld [vmem:[#allocation2 + $0x40] ss:$2 sm:$0x7f]  ;;  %v81_v20 = vadd.f32 %v67_v15, %v57_v14  ;;  %v35_v21 = vld [vmem:[#allocation2 + $0x50] ss:$2 sm:$0x7f] }
  0x14   :  { %v49_v22 = vld [vmem:[#allocation2 + $0x41] ss:$2 sm:$0x7f]  ;;  %v51_v25 = vld [vmem:[#allocation2 + $0x51] ss:$2 sm:$0x7f] }
  0x15   :  { %v104_v23 = vadd.f32 %v89_v16, %v80_v17  ;;  %v60_v26 = vadd.f32 %v49_v22, %v33_v19  ;;  %v73_v27 = vld [vmem:[#allocation2 + $0x42] ss:$2 sm:$0x7f]  ;;  %v105_v28 = vadd.f32 %v91_v18, %v81_v20  ;;  %v61_v29 = vadd.f32 %v51_v25, %v35_v21  ;;  %v75_v30 = vld [vmem:[#allocation2 + $0x52] ss:$2 sm:$0x7f] }
  0x16   :  { %v97_v31 = vld [vmem:[#allocation2 + $0x43] ss:$2 sm:$0x7f]  ;;  %v99_v35 = vld [vmem:[#allocation2 + $0x53] ss:$2 sm:$0x7f] }
  0x17   :  { %v122_v32 = vcombine.high %v104_v23, %v104_v23  ;;  %v129_v33 = vrot.slane %v104_v23, %v1841_v24  ;;  %v84_v34 = vadd.f32 %v73_v27, %v60_v26  ;;  %v29_v36 = vld [vmem:[#allocation2 + $0x20] ss:$2 sm:$0x7f]  ;;  %v177_v37 = vrot.slane %v105_v28, %v1841_v24  ;;  %v45_v39 = vld [vmem:[#allocation2 + $0x21] ss:$2 sm:$0x7f] }
  0x18   :  { %v85_v38 = vadd.f32 %v75_v30, %v61_v29  ;;  %v170_v40 = vcombine.high %v105_v28, %v105_v28  ;;  %v69_v45 = vld [vmem:[#allocation2 + $0x22] ss:$2 sm:$0x7f]  ;;  %v58_v48 = vadd.f32 %v45_v39, %v29_v36  ;;  %v93_v7 = vld [vmem:[#allocation2 + $0x23] ss:$2 sm:$0x7f] }
  0x19   :  { %v136_v41 = vrot.slane %v122_v32, %v1841_v24  ;;  %v137_v42 = vcombine.high %v129_v33, %v129_v33  ;;  %v145_v43 = vrot.slane %v129_v33, %v1841_v24  ;;  %v1847_v44 = vadd.f32 %v97_v31, %v84_v34  ;;  %v37_v33 = vld [vmem:[#allocation2 + $0x60] ss:$2 sm:$0x7f]  ;;  %v53_v34 = vld [vmem:[#allocation2 + $0x61] ss:$2 sm:$0x7f] }
  0x1a   :  { %v1850_v46 = vrot.slane %v177_v37, %v1841_v24  ;;  %v109_v47 = vadd.f32 %v99_v35, %v85_v38  ;;  %v184_v49 = vrot.slane %v170_v40, %v1841_v24  ;;  %v82_v56 = vadd.f32 %v69_v45, %v58_v48 }
  0x1b   :  { %v138_v50 = vcombine.high %v136_v41, %v136_v41  ;;  %v152_v51 = vrot.slane %v136_v41, %v1841_v24  ;;  %v159_v52 = vrot.slane %v137_v42, %v1841_v24  ;;  %v314_v53 = vcombine.high %v1847_v44, %v1847_v44 }
  0x1c   :  { %v362_v54 = vcombine.high %v109_v47, %v109_v47  ;;  %v369_v55 = vrot.slane %v109_v47, %v1841_v24  ;;  %v185_v57 = vcombine.high %v177_v37, %v177_v37  ;;  %v1876_v19 = vadd.f32 %v93_v7, %v82_v56 }
  0x1d   :  { %v166_v58 = vrot.slane %v138_v50, %v1841_v24  ;;  %v168_v59 = vcombine.high %v152_v51, %v152_v51  ;;  %v506_v60 = vcombine.low %v145_v43, %v159_v52  ;;  %v1720_v61 = vcombine.high %v145_v43, %v159_v52  ;;  %v77_v43 = vld [vmem:[#allocation2 + $0x62] ss:$2 sm:$0x7f]  ;;  %v101_v50 = vld [vmem:[#allocation2 + $0x63] ss:$2 sm:$0x7f] }
  0x1e   :  { %v328_v62 = vrot.slane %v314_v53, %v1841_v24  ;;  %v1861_v63 = vrot.slane %v362_v54, %v1841_v24  ;;  %v377_v1 = vcombine.high %v369_v55, %v369_v55  ;;  %v385_v2 = vrot.slane %v369_v55, %v1841_v24  ;;  %v47_v55 = vld [vmem:[#allocation2 + $0x31] ss:$2 sm:$0x7f] }
  0x1f   :  { %v508_v3 = vcombine.low %v152_v51, %v166_v58  ;;  %v509_v4 = vcombine.low %v168_v59, %v1850_v46  ;;  %v516_v5 = vrot.slane %v506_v60, %v1841_v24  ;;  %v523_v6 = vrot.slane %v1720_v61, %v1841_v24 }
  0x20   :  { %v330_v8 = vcombine.high %v328_v62, %v328_v62  ;;  %v344_v9 = vrot.slane %v328_v62, %v1841_v24  ;;  %v1870_v10 = vrot.slane %v1861_v63, %v1841_v24  ;;  %v399_v11 = vrot.slane %v377_v1, %v1841_v24 }
  0x21   :  { %v530_v12 = vrot.slane %v508_v3, %v1841_v24  ;;  %v537_v13 = vrot.slane %v509_v4, %v1841_v24  ;;  %v538_v14 = vcombine.low %v516_v5, %v523_v6  ;;  %v407_v15 = vcombine.high %v385_v2, %v385_v2 }
  0x22   :  { %v358_v16 = vrot.slane %v330_v8, %v1841_v24  ;;  %v360_v17 = vcombine.high %v344_v9, %v344_v9  ;;  %v409_v18 = vcombine.high %v399_v11, %v399_v11  ;;  %v186_v23 = vcombine.high %v184_v49, %v184_v49 }
  0x23   :  { %v539_v20 = vcombine.low %v530_v12, %v537_v13  ;;  %v546_v21 = vrot.slane %v538_v14, %v1841_v24  ;;  %v704_v22 = vcombine.low %v399_v11, %v407_v15  ;;  %v200_v28 = vrot.slane %v184_v49, %v1841_v24  ;;  %v95_v11 = vld [vmem:[#allocation2 + $0x33] ss:$2 sm:$0x7f] }
  0x24   :  { %v702_v25 = vcombine.low %v344_v9, %v358_v16  ;;  %v703_v26 = vcombine.low %v360_v17, %v385_v2  ;;  %v705_v27 = vcombine.low %v409_v18, %v1870_v10  ;;  %v207_v31 = vrot.slane %v185_v57, %v1841_v24  ;;  %v71_v2 = vld [vmem:[#allocation2 + $0x32] ss:$2 sm:$0x7f] }
  0x25   :  { %v553_v29 = vrot.slane %v539_v20, %v1841_v24  ;;  %v726_v30 = vrot.slane %v704_v22, %v1841_v24  ;;  %v214_v32 = vrot.slane %v186_v23, %v1841_v24  ;;  %v215_v38 = vcombine.high %v1850_v46, %v1850_v46  ;;  %v31_v46 = vld [vmem:[#allocation2 + $0x30] ss:$2 sm:$0x7f] }
  0x26   :  { %v712_v35 = vrot.slane %v702_v25, %v1841_v24  ;;  %v719_v36 = vrot.slane %v703_v26, %v1841_v24  ;;  %v733_v37 = vrot.slane %v705_v27, %v1841_v24  ;;  %v216_v40 = vcombine.high %v200_v28, %v200_v28 }
  0x27   :  { %v554_v39 = vcombine.low %v546_v21, %v553_v29  ;;  %v217_v41 = vcombine.high %v207_v31, %v207_v31  ;;  %v225_v42 = vrot.slane %v1876_v19, %v1841_v24  ;;  %v555_v48 = vcombine.low %v207_v31, %v215_v38 }
  0x28   :  { %v734_v45 = vcombine.low %v712_v35, %v719_v36  ;;  %v735_v47 = vcombine.low %v726_v30, %v733_v37  ;;  %v62_v49 = vadd.f32 %v53_v34, %v37_v33  ;;  %v557_v54 = vcombine.low %v214_v32, %v216_v40  ;;  %v39_v32 = vld [vmem:[#allocation2 + $0x70] ss:$2 sm:$0x7f]  ;;  %v55_v33 = vld [vmem:[#allocation2 + $0x71] ss:$2 sm:$0x7f] }
  0x29   :  { %1751 = vmatmul.mubr.msk.f32.vlgmr.msra.gmra.mxu0 %vm849_vm1, %v554_v39  ;;  %v233_v51 = vcombine.high %v225_v42, %v225_v42  ;;  %v241_v52 = vrot.slane %v225_v42, %v1841_v24  ;;  %v556_v53 = vcombine.low %v217_v41, %v200_v28  ;;  %v565_v58 = vrot.slane %v555_v48, %v1841_v24  ;;  %v79_v42 = vld [vmem:[#allocation2 + $0x72] ss:$2 sm:$0x7f] }
  0x2a   :  { %v742_v56 = vrot.slane %v734_v45, %v1841_v24  ;;  %v749_v57 = vrot.slane %v735_v47, %v1841_v24  ;;  %1753 = vmatprep.mubr.msk.f32.mxu0 %vm1807_vm0, %v1806_v0  ;;  %v86_v59 = vadd.f32 %v77_v43, %v62_v49  ;;  %v579_v62 = vrot.slane %v557_v54, %v1841_v24 }
  0x2b   :  { %v255_v60 = vrot.slane %v233_v51, %v1841_v24  ;;  %v572_v61 = vrot.slane %v556_v53, %v1841_v24  ;;  %v378_v1 = vcombine.high %v1861_v63, %v1861_v63  ;;  %v408_v5 = vcombine.high %v1870_v10, %v1870_v10  ;;  %v103_v53 = vld [vmem:[#allocation2 + $0x73] ss:$2 sm:$0x7f] }
  0x2c   :  { %v750_v3 = vcombine.low %v742_v56, %v749_v57  ;;  %v110_v4 = vadd.f32 %v101_v50, %v86_v59  ;;  %v59_v6 = vadd.f32 %v47_v55, %v31_v46  ;;  %v218_v12 = vcombine.high %v1876_v19, %v1876_v19 }
  0x2d   :  { %v558_v7 = vcombine.low %v241_v52, %v255_v60  ;;  %v587_v8 = vcombine.low %v565_v58, %v572_v61  ;;  %v406_v9 = vrot.slane %v378_v1, %v1841_v24  ;;  %v1721_v15 = vcombine.high %v241_v52, %v255_v60 }
  0x2e   :  { %1763 = vmatmul.mubr.msk.f32.vlgmr.msra.gmra.mxu1 %vm849_vm1, %v750_v3  ;;  %v410_v13 = vcombine.high %v110_v4, %v110_v4  ;;  %v417_v63 = vrot.slane %v110_v4, %v1841_v24  ;;  %v83_v14 = vadd.f32 %v71_v2, %v59_v6  ;;  %v232_v18 = vrot.slane %v218_v12, %v1841_v24 }
  0x2f   :  { %1765 = vmatprep.mubr.msk.f32.mxu1 %vm1807_vm0, %v1806_v0  ;;  %v586_v10 = vrot.slane %v558_v7, %v1841_v24  ;;  %v595_v16 = vrot.slane %v587_v8, %v1841_v24  ;;  %v751_v17 = vcombine.low %v406_v9, %v408_v5  ;;  %v614_v37 = vrot.slane %v1721_v15, %v1841_v24 }
  0x30   :  { %v424_v20 = vrot.slane %v410_v13, %v1841_v24  ;;  %v425_v19 = vcombine.high %v417_v63, %v417_v63  ;;  %v433_v21 = vrot.slane %v417_v63, %v1841_v24  ;;  %v107_v22 = vadd.f32 %v95_v11, %v83_v14 }
  0x31   :  { %v588_v23 = vcombine.low %v579_v62, %v586_v10  ;;  %v761_v25 = vrot.slane %v751_v17, %v1841_v24  ;;  %v234_v26 = vcombine.high %v232_v18, %v232_v18  ;;  %v248_v27 = vrot.slane %v232_v18, %v1841_v24 }
  0x32   :  { %v426_v28 = vcombine.high %v424_v20, %v424_v20  ;;  %v1921_v29 = vrot.slane %v424_v20, %v1841_v24  ;;  %v447_v30 = vrot.slane %v425_v19, %v1841_v24  ;;  %v273_v31 = vrot.slane %v107_v22, %v1841_v24 }
  0x33   :  { %v602_v34 = vrot.slane %v588_v23, %v1841_v24  ;;  %v262_v35 = vrot.slane %v234_v26, %v1841_v24  ;;  %v264_v36 = vcombine.high %v248_v27, %v248_v27  ;;  %v63_v48 = vadd.f32 %v55_v33, %v39_v32 }
  0x34   :  { %v454_v38 = vrot.slane %v426_v28, %v1841_v24  ;;  %v752_v39 = vcombine.low %v433_v21, %v447_v30  ;;  %v1723_v40 = vcombine.high %v433_v21, %v447_v30  ;;  %v281_v41 = vcombine.high %v273_v31, %v273_v31 }
  0x35   :  { %v603_v43 = vcombine.low %v595_v16, %v602_v34  ;;  %v289_v45 = vrot.slane %v273_v31, %v1841_v24  ;;  %v605_v47 = vcombine.low %v248_v27, %v262_v35  ;;  %v87_v56 = vadd.f32 %v79_v42, %v63_v48 }
  0x36   :  { %v754_v49 = vcombine.low %v1921_v29, %v454_v38  ;;  %v768_v50 = vrot.slane %v752_v39, %v1841_v24  ;;  %v775_v51 = vrot.slane %v1723_v40, %v1841_v24  ;;  %v303_v52 = vrot.slane %v281_v41, %v1841_v24 }
  0x37   :  { %1754 = vmatmul.mubr.msk.f32.gmra.mxu0 %vm849_vm1, %v603_v43  ;;  %v311_v54 = vcombine.high %v289_v45, %v289_v45  ;;  %v606_v46 = vcombine.low %v264_v36, %v289_v45  ;;  %v621_v55 = vrot.slane %v605_v47, %v1841_v24  ;;  %v456_v59 = vcombine.high %v1921_v29, %v1921_v29 }
  0x38   :  { %v782_v57 = vrot.slane %v754_v49, %v1841_v24  ;;  %v783_v58 = vcombine.low %v761_v25, %v768_v50  ;;  %1756 = vmatprep.mubr.msk.f32.mxu0 %vm1807_vm0, %v1806_v0  ;;  %v266_v60 = vcombine.high %v107_v22, %v107_v22  ;;  %v111_v2 = vadd.f32 %v103_v53, %v87_v56 }
  0x39   :  { %v607_v61 = vcombine.low %v303_v52, %v311_v54  ;;  %v628_v62 = vrot.slane %v606_v46, %v1841_v24  ;;  %v636_v1 = vcombine.low %v614_v37, %v621_v55  ;;  %v313_v6 = vcombine.high %v303_v52, %v303_v52 }
  0x3a   :  { %v784_v3 = vcombine.low %v775_v51, %v782_v57  ;;  %v791_v4 = vrot.slane %v783_v58, %v1841_v24  ;;  %v280_v5 = vrot.slane %v266_v60, %v1841_v24  ;;  %v458_v9 = vcombine.high %v111_v2, %v111_v2 }
  0x3b   :  { %v635_v7 = vrot.slane %v607_v61, %v1841_v24  ;;  %v644_v8 = vrot.slane %v636_v1, %v1841_v24  ;;  %v465_v11 = vrot.slane %v111_v2, %v1841_v24  ;;  %v321_v14 = vrot.slane %v1847_v44, %v1841_v24 }
  0x3c   :  { %v798_v12 = vrot.slane %v784_v3, %v1841_v24  ;;  %v282_v13 = vcombine.high %v280_v5, %v280_v5  ;;  %v296_v63 = vrot.slane %v280_v5, %v1841_v24  ;;  %v472_v10 = vrot.slane %v458_v9, %v1841_v24 }
  0x3d   :  { %v637_v15 = vcombine.low %v628_v62, %v635_v7  ;;  %v473_v16 = vcombine.high %v465_v11, %v465_v11  ;;  %v481_v17 = vrot.slane %v465_v11, %v1841_v24  ;;  %v329_v21 = vcombine.high %v321_v14, %v321_v14 }
  0x3e   :  { %v799_v18 = vcombine.low %v791_v4, %v798_v12  ;;  %v310_v20 = vrot.slane %v282_v13, %v1841_v24  ;;  %v312_v19 = vcombine.high %v296_v63, %v296_v63  ;;  %v474_v23 = vcombine.high %v472_v10, %v472_v10 }
  0x3f   :  { %v651_v22 = vrot.slane %v637_v15, %v1841_v24  ;;  %v488_v25 = vrot.slane %v472_v10, %v1841_v24  ;;  %v495_v26 = vrot.slane %v473_v16, %v1841_v24  ;;  %v503_v44 = vcombine.high %v481_v17, %v481_v17 }
  0x40   :  { %1766 = vmatmul.mubr.msk.f32.gmra.mxu1 %vm849_vm1, %v799_v18  ;;  %v800_v27 = vcombine.low %v456_v59, %v481_v17  ;;  %v337_v28 = vrot.slane %v321_v14, %v1841_v24  ;;  %v351_v29 = vrot.slane %v329_v21, %v1841_v24  ;;  %v502_v31 = vrot.slane %v474_v23, %v1841_v24 }
  0x41   :  { %v652_v30 = vcombine.low %v644_v8, %v651_v22  ;;  %1768 = vmatprep.mubr.msk.f32.mxu1 %vm1807_vm0, %v1806_v0  ;;  %v504_v32 = vcombine.high %v488_v25, %v488_v25  ;;  %v505_v33 = vcombine.high %v495_v26, %v495_v26  ;;  %v801_v34 = vcombine.low %v495_v26, %v503_v44 }
  0x42   :  { %v810_v35 = vrot.slane %v800_v27, %v1841_v24  ;;  %v653_v36 = vcombine.low %v313_v6, %v296_v63  ;;  %v654_v37 = vcombine.low %v310_v20, %v312_v19  ;;  %v655_v40 = vcombine.low %v337_v28, %v351_v29 }
  0x43   :  { %1757 = vmatmul.mubr.msk.f32.gmra.mxu0 %vm849_vm1, %v652_v30  ;;  %v802_v38 = vcombine.low %v505_v33, %v488_v25  ;;  %v803_v39 = vcombine.low %v502_v31, %v504_v32  ;;  %v1722_v41 = vcombine.high %v337_v28, %v351_v29  ;;  %v817_v42 = vrot.slane %v801_v34, %v1841_v24 }
  0x44   :  { %1759 = vmatprep.mubr.msk.f32.mxu0 %vm1807_vm0, %v1806_v0  ;;  %v663_v43 = vrot.slane %v653_v36, %v1841_v24  ;;  %v670_v45 = vrot.slane %v654_v37, %v1841_v24  ;;  %v677_v49 = vrot.slane %v655_v40, %v1841_v24 }
  0x45   :  { %v824_v47 = vrot.slane %v802_v38, %v1841_v24  ;;  %v831_v48 = vrot.slane %v803_v39, %v1841_v24  ;;  %v684_v50 = vrot.slane %v1722_v41, %v1841_v24  ;;  %v832_v51 = vcombine.low %v810_v35, %v817_v42 }
  0x46   :  { %v685_v52 = vcombine.low %v663_v43, %v670_v45 }
  0x47   :  { %v833_v53 = vcombine.low %v824_v47, %v831_v48  ;;  %v686_v54 = vcombine.low %v677_v49, %v684_v50  ;;  %v840_v46 = vrot.slane %v832_v51, %v1841_v24 }
  0x48   :  { %v693_v0 = vrot.slane %v685_v52, %v1841_v24 }
  0x49   :  { %v847_v55 = vrot.slane %v833_v53, %v1841_v24  ;;  %v700_v56 = vrot.slane %v686_v54, %v1841_v24 }
  0x4b   :  { %v848_v57 = vcombine.low %v840_v46, %v847_v55  ;;  %v701_v58 = vcombine.low %v693_v0, %v700_v56 }
  0x4d   :  { %1769 = vmatmul.mubr.msk.f32.gmra.mxu1 %vm849_vm1, %v848_v57  ;;  %1760 = vmatmul.mubr.msk.f32.gmra.mxu0 %vm849_vm1, %v701_v58 }
  0xe9   :  { %v930_v59 = vpop.f32.mrf.mxu0 }
  0xea   :  { %v971_v60 = vcombine.high %v930_v59, %v930_v59  ;;  %v978_v61 = vrot.slane %v930_v59, %v1841_v24 }
  0xeb   :  { %v1752_v62 = vpop.f32.mrf.mxu0 }
  0xec   :  { %v985_v1 = vrot.slane %v971_v60, %v1841_v24  ;;  %v986_v2 = vcombine.high %v978_v61, %v978_v61  ;;  %v994_v4 = vrot.slane %v978_v61, %v1841_v24 }
  0xee   :  { %v987_v3 = vcombine.high %v985_v1, %v985_v1  ;;  %v1001_v5 = vrot.slane %v985_v1, %v1841_v24  ;;  %v1008_v6 = vrot.slane %v986_v2, %v1841_v24  ;;  %v950_v7 = vpop.f32.mrf.mxu1 }
  0xef   :  { %v1167_v8 = vcombine.high %v950_v7, %v950_v7  ;;  %v1174_v9 = vrot.slane %v950_v7, %v1841_v24 }
  0xf0   :  { %v1015_v11 = vrot.slane %v987_v3, %v1841_v24  ;;  %v1017_v12 = vcombine.high %v1001_v5, %v1001_v5  ;;  %v1314_v13 = vcombine.low %v994_v4, %v1008_v6  ;;  %v1731_v63 = vcombine.high %v994_v4, %v1008_v6  ;;  %v1764_v14 = vpop.f32.mrf.mxu1 }
  0xf1   :  { %v1181_v15 = vrot.slane %v1167_v8, %v1841_v24  ;;  %v1182_v10 = vcombine.high %v1174_v9, %v1174_v9  ;;  %v2003_v36 = vrot.slane %v1174_v9, %v1841_v24 }
  0xf2   :  { %v1316_v16 = vcombine.low %v1001_v5, %v1015_v11  ;;  %v1323_v17 = vrot.slane %v1314_v13, %v1841_v24  ;;  %v1330_v18 = vrot.slane %v1731_v63, %v1841_v24  ;;  %v1344_v23 = vrot.slane %v1017_v12, %v1841_v24 }
  0xf3   :  { %v1183_v20 = vcombine.high %v1181_v15, %v1181_v15  ;;  %v1197_v19 = vrot.slane %v1181_v15, %v1841_v24  ;;  %v1992_v21 = vrot.slane %v1182_v10, %v1841_v24  ;;  %v1019_v39 = vcombine.high %v1015_v11, %v1015_v11 }
  0xf4   :  { %v1337_v22 = vrot.slane %v1316_v16, %v1841_v24  ;;  %v1345_v25 = vcombine.low %v1323_v17, %v1330_v18  ;;  %v1212_v50 = vcombine.high %v2003_v36, %v2003_v36 }
  0xf5   :  { %v1211_v26 = vrot.slane %v1183_v20, %v1841_v24  ;;  %v1213_v44 = vcombine.high %v1197_v19, %v1197_v19  ;;  %v1214_v27 = vcombine.high %v1992_v21, %v1992_v21  ;;  %v1508_v56 = vcombine.low %v2003_v36, %v1992_v21 }
  0xf6   :  { %v1346_v28 = vcombine.low %v1337_v22, %v1344_v23  ;;  %v1353_v32 = vrot.slane %v1345_v25, %v1841_v24  ;;  %v2025_v60 = vrot.slane %v1212_v50, %v1841_v24 }
  0xf7   :  { %v1554_v29 = vcombine.low %v1214_v27, %v1197_v19  ;;  %v1555_v30 = vcombine.low %v1211_v26, %v1213_v44  ;;  %v935_v31 = vpop.f32.mrf.mxu0  ;;  %v1215_v61 = vcombine.high %v1211_v26, %v1211_v26 }
  0xf8   :  { %v1360_v33 = vrot.slane %v1346_v28, %v1841_v24  ;;  %v1020_v34 = vcombine.high %v935_v31, %v935_v31  ;;  %v1027_v35 = vrot.slane %v935_v31, %v1841_v24 }
  0xf9   :  { %v1563_v37 = vrot.slane %v1554_v29, %v1841_v24  ;;  %v1570_v38 = vrot.slane %v1555_v30, %v1841_v24  ;;  %v1755_v40 = vpop.f32.mrf.mxu0 }
  0xfa   :  { %v1361_v41 = vcombine.low %v1353_v32, %v1360_v33  ;;  %v1034_v42 = vrot.slane %v1020_v34, %v1841_v24  ;;  %v1035_v43 = vcombine.high %v1027_v35, %v1027_v35  ;;  %v1043_v45 = vrot.slane %v1027_v35, %v1841_v24 }
  0xfb   :  { %v2016_v51 = vcombine.low %v1563_v37, %v1570_v38  ;;  %v2053_v40 = vrot.slane %v1508_v56, %v1841_v24 }
  0xfc   :  { %1707 = vst.msk [vmem:[%s2126_s2] sm:$0x7f] %vm1706_vm2, %v1361_v41  ;;  %v1036_v47 = vcombine.high %v1034_v42, %v1034_v42  ;;  %v1057_v48 = vrot.slane %v1035_v43, %v1841_v24  ;;  %v1065_v49 = vcombine.high %v1043_v45, %v1043_v45  ;;  %v1362_v52 = vcombine.low %v1019_v39, %v1043_v45 }
  0xfd   :  { %v1050_v53 = vrot.slane %v1034_v42, %v1841_v24  ;;  %v1593_v2 = vrot.slane %v2016_v51, %v1841_v24 }
  0xfe   :  { %v1064_v54 = vrot.slane %v1036_v47, %v1841_v24  ;;  %v1067_v46 = vcombine.high %v1057_v48, %v1057_v48  ;;  %v1363_v0 = vcombine.low %v1057_v48, %v1065_v49  ;;  %v1371_v55 = vrot.slane %v1362_v52, %v1841_v24 }
 0x100   :  { %v1364_v57 = vcombine.low %v1067_v46, %v1050_v53  ;;  %v1378_v58 = vrot.slane %v1363_v0, %v1841_v24  ;;  %v955_v59 = vpop.f32.mrf.mxu1  ;;  %v1392_v4 = vrot.slane %v1064_v54, %v1841_v24  ;;  %v1732_v7 = vcombine.high %v1050_v53, %v1064_v54 }
 0x101   :  { %v1216_v62 = vcombine.high %v955_v59, %v955_v59  ;;  %v1223_v1 = vrot.slane %v955_v59, %v1841_v24 }
 0x102   :  { %v1385_v3 = vrot.slane %v1364_v57, %v1841_v24  ;;  %v1393_v5 = vcombine.low %v1371_v55, %v1378_v58  ;;  %v1767_v6 = vpop.f32.mrf.mxu1  ;;  %v1419_v41 = vrot.slane %v1732_v7, %v1841_v24 }
 0x103   :  { %v1230_v8 = vrot.slane %v1216_v62, %v1841_v24  ;;  %v1231_v9 = vcombine.high %v1223_v1, %v1223_v1  ;;  %v1239_v11 = vrot.slane %v1223_v1, %v1841_v24  ;;  %v940_v12 = vpop.f32.mrf.mxu0 }
 0x104   :  { %v1394_v13 = vcombine.low %v1385_v3, %v1392_v4  ;;  %v1401_v63 = vrot.slane %v1393_v5, %v1841_v24  ;;  %v1069_v14 = vcombine.high %v940_v12, %v940_v12  ;;  %v1076_v15 = vrot.slane %v940_v12, %v1841_v24 }
 0x105   :  { %v1232_v10 = vcombine.high %v1230_v8, %v1230_v8  ;;  %v1246_v16 = vrot.slane %v1230_v8, %v1841_v24  ;;  %v1253_v17 = vrot.slane %v1231_v9, %v1841_v24  ;;  %v1556_v18 = vcombine.low %v1215_v61, %v1239_v11  ;;  %v1758_v20 = vpop.f32.mrf.mxu0 }
 0x106   :  { %v1408_v19 = vrot.slane %v1394_v13, %v1841_v24  ;;  %v1083_v21 = vrot.slane %v1069_v14, %v1841_v24  ;;  %v1084_v22 = vcombine.high %v1076_v15, %v1076_v15  ;;  %v1092_v23 = vrot.slane %v1076_v15, %v1841_v24 }
 0x107   :  { %v1260_v25 = vrot.slane %v1232_v10, %v1841_v24  ;;  %v1577_v26 = vrot.slane %v1556_v18, %v1841_v24  ;;  %v1584_v44 = vrot.slane %v1253_v17, %v1841_v24  ;;  %v1735_v27 = vcombine.high %v1239_v11, %v1253_v17 }
 0x108   :  { %v1409_v28 = vcombine.low %v1401_v63, %v1408_v19  ;;  %v1085_v29 = vcombine.high %v1083_v21, %v1083_v21  ;;  %v1099_v30 = vrot.slane %v1083_v21, %v1841_v24  ;;  %v1106_v31 = vrot.slane %v1084_v22, %v1841_v24 }
 0x109   :  { %v1586_v32 = vcombine.low %v1577_v26, %v1584_v44  ;;  %v1603_v33 = vcombine.low %v1246_v16, %v1260_v25  ;;  %v1736_v34 = vcombine.high %v1246_v16, %v1260_v25  ;;  %v1611_v35 = vrot.slane %v1735_v27, %v1841_v24 }
 0x10a   :  { %1708 = vst.msk [vmem:[%s2126_s2 + $0x8] sm:$0x7f] %vm1706_vm2, %v1409_v28  ;;  %v1113_v36 = vrot.slane %v1085_v29, %v1841_v24  ;;  %v1115_v37 = vcombine.high %v1099_v30, %v1099_v30  ;;  %v1411_v38 = vcombine.low %v1092_v23, %v1106_v31  ;;  %v1733_v39 = vcombine.high %v1092_v23, %v1106_v31 }
 0x10b   :  { %v1600_v42 = vrot.slane %v1586_v32, %v1841_v24  ;;  %v1618_v43 = vrot.slane %v1603_v33, %v1841_v24  ;;  %v1440_v48 = vrot.slane %v1099_v30, %v1841_v24  ;;  %v1625_v53 = vrot.slane %v1736_v34, %v1841_v24 }
 0x10c   :  { %v1426_v45 = vrot.slane %v1411_v38, %v1841_v24  ;;  %v1433_v47 = vrot.slane %v1733_v39, %v1841_v24  ;;  %v2061_v49 = vcombine.low %v1113_v36, %v1115_v37  ;;  %v1117_v46 = vcombine.high %v1113_v36, %v1113_v36 }
 0x10d   :  { %v1601_v50 = vcombine.low %v1593_v2, %v1600_v42  ;;  %v1633_v51 = vcombine.low %v1611_v35, %v1618_v43  ;;  %v960_v52 = vpop.f32.mrf.mxu1  ;;  %v945_v54 = vpop.f32.mrf.mxu0 }
 0x10e   :  { %v1441_v0 = vcombine.low %v1419_v41, %v1426_v45  ;;  %v1442_v55 = vcombine.low %v1433_v47, %v1440_v48  ;;  %v1265_v56 = vcombine.high %v960_v52, %v960_v52  ;;  %v1272_v57 = vrot.slane %v960_v52, %v1841_v24 }
 0x10f   :  { %v1641_v58 = vrot.slane %v1633_v51, %v1841_v24  ;;  %1712 = vst.msk [vmem:[%s2126_s2 + $0x28] sm:$0x7f] %vm1706_vm2, %v1601_v50  ;;  %v1118_v59 = vcombine.high %v945_v54, %v945_v54  ;;  %v1125_v61 = vrot.slane %v945_v54, %v1841_v24  ;;  %v1467_v62 = vrot.slane %v2061_v49, %v1841_v24  ;;  %v1770_v1 = vpop.f32.mrf.mxu1  ;;  %v1761_v2 = vpop.f32.mrf.mxu0 }
 0x110   :  { %v1449_v3 = vrot.slane %v1441_v0, %v1841_v24  ;;  %v1456_v4 = vrot.slane %v1442_v55, %v1841_v24  ;;  %v1279_v5 = vrot.slane %v1265_v56, %v1841_v24  ;;  %v1280_v6 = vcombine.high %v1272_v57, %v1272_v57 }
 0x111   :  { %v1288_v7 = vrot.slane %v1272_v57, %v1841_v24  ;;  %v1132_v8 = vrot.slane %v1118_v59, %v1841_v24  ;;  %v1133_v9 = vcombine.high %v1125_v61, %v1125_v61  ;;  %v1141_v11 = vrot.slane %v1125_v61, %v1841_v24 }
 0x112   :  { %v1457_v12 = vcombine.low %v1449_v3, %v1456_v4  ;;  %v1281_v13 = vcombine.high %v1279_v5, %v1279_v5  ;;  %v1295_v63 = vrot.slane %v1279_v5, %v1841_v24  ;;  %v1302_v14 = vrot.slane %v1280_v6, %v1841_v24 }
 0x113   :  { %v1310_v15 = vcombine.high %v1288_v7, %v1288_v7  ;;  %v1632_v10 = vrot.slane %v1288_v7, %v1841_v24  ;;  %v1134_v16 = vcombine.high %v1132_v8, %v1132_v8  ;;  %v1148_v17 = vrot.slane %v1132_v8, %v1841_v24 }
 0x114   :  { %1709 = vst.msk [vmem:[%s2126_s2 + $0x10] sm:$0x7f] %vm1706_vm2, %v1457_v12  ;;  %v1309_v18 = vrot.slane %v1281_v13, %v1841_v24  ;;  %v1311_v20 = vcombine.high %v1295_v63, %v1295_v63  ;;  %v1312_v19 = vcombine.high %v1302_v14, %v1302_v14  ;;  %v1155_v21 = vrot.slane %v1133_v9, %v1841_v24 }
 0x115   :  { %v1634_v22 = vcombine.low %v1625_v53, %v1632_v10  ;;  %v1650_v23 = vcombine.low %v1302_v14, %v1310_v15  ;;  %v1162_v25 = vrot.slane %v1134_v16, %v1841_v24  ;;  %v1163_v26 = vcombine.high %v1141_v11, %v1141_v11 }
 0x116   :  { %v1313_v44 = vcombine.high %v1309_v18, %v1309_v18  ;;  %v1651_v27 = vcombine.low %v1312_v19, %v1295_v63  ;;  %v1652_v28 = vcombine.low %v1309_v18, %v1311_v20  ;;  %v1165_v29 = vcombine.high %v1155_v21, %v1155_v21 }
 0x117   :  { %v1648_v30 = vrot.slane %v1634_v22, %v1841_v24  ;;  %v1659_v31 = vrot.slane %v1650_v23, %v1841_v24  ;;  %v1459_v32 = vcombine.low %v1117_v46, %v1141_v11  ;;  %v1460_v33 = vcombine.low %v1155_v21, %v1163_v26 }
 0x118   :  { %v1666_v34 = vrot.slane %v1651_v27, %v1841_v24  ;;  %v1673_v35 = vrot.slane %v1652_v28, %v1841_v24  ;;  %v1680_v36 = vrot.slane %v1313_v44, %v1841_v24  ;;  %v1488_v37 = vrot.slane %v1165_v29, %v1841_v24 }
 0x119   :  { %v1649_v38 = vcombine.low %v1641_v58, %v1648_v30  ;;  %v1474_v39 = vrot.slane %v1459_v32, %v1841_v24  ;;  %v1481_v41 = vrot.slane %v1460_v33, %v1841_v24  ;;  %v1506_v42 = vcombine.low %v1148_v17, %v1162_v25 }
 0x11a   :  { %v1681_v43 = vcombine.low %v1659_v31, %v1666_v34  ;;  %v1682_v45 = vcombine.low %v1673_v35, %v1680_v36  ;;  %v1734_v47 = vcombine.high %v1148_v17, %v1162_v25  ;;  %v1538_v51 = vcombine.low %v2053_v40, %v2025_v60 }
 0x11b   :  { %1713 = vst.msk [vmem:[%s2126_s2 + $0x30] sm:$0x7f] %vm1706_vm2, %v1649_v38  ;;  %v1489_v48 = vcombine.low %v1467_v62, %v1474_v39  ;;  %v1490_v49 = vcombine.low %v1481_v41, %v1488_v37  ;;  %v1515_v50 = vrot.slane %v1506_v42, %v1841_v24 }
 0x11c   :  { %v1689_v52 = vrot.slane %v1681_v43, %v1841_v24  ;;  %v1696_v53 = vrot.slane %v1682_v45, %v1841_v24  ;;  %v1522_v54 = vrot.slane %v1734_v47, %v1841_v24  ;;  %v1552_v58 = vrot.slane %v1538_v51, %v1841_v24 }
 0x11d   :  { %v1497_v46 = vrot.slane %v1489_v48, %v1841_v24  ;;  %v1504_v0 = vrot.slane %v1490_v49, %v1841_v24 }
 0x11e   :  { %v1697_v55 = vcombine.low %v1689_v52, %v1696_v53  ;;  %v1537_v56 = vcombine.low %v1515_v50, %v1522_v54 }
 0x11f   :  { %v1505_v57 = vcombine.low %v1497_v46, %v1504_v0 }
 0x120   :  { %1714 = vst.msk [vmem:[%s2126_s2 + $0x38] sm:$0x7f] %vm1706_vm2, %v1697_v55  ;;  %v1545_v60 = vrot.slane %v1537_v56, %v1841_v24 }
 0x121   :  { %1710 = vst.msk [vmem:[%s2126_s2 + $0x18] sm:$0x7f] %vm1706_vm2, %v1505_v57 }
 0x122   :  { %v1553_v40 = vcombine.low %v1545_v60, %v1552_v58 }
 0x124   :  { %1711 = vst.msk [vmem:[%s2126_s2 + $0x20] sm:$0x7f] %vm1706_vm2, %v1553_v40 }
 0x125   :  { %1719 = vsyncpa [#allocation3], 1 }

</bundles_post_ra>
